<compile_context>
chip_gen: v7x
topology: tpu7x:2x2x1
jax: 0.10.0
libtpu: 0.0.40
codegen_flags: <defaults>
</compile_context>

<pallas_src>
import functools

import jax
import jax.numpy as jnp
import numpy as np
from jax import lax
from jax.experimental import pallas as pl
from jax.experimental.pallas import tpu as pltpu


def famodule_kernel(x_ref, w1c_ref, w2c_ref, b_ref, o_ref, *, H):
    """Fused conva -> (fa) -> convb on a lane-packed row slab.

    x_ref  : (R, W*Cin)         R = images_per_block * H rows of lane-packed NHWC input
    w1c_ref: (W*Cin,  3*W*Cmid) concatenated banded conv-a weights (BN scale folded), bf16
    w2c_ref: (W*Cmid, 3*W*Cout) concatenated banded conv-b weights (BN scale folded), bf16
    b_ref  : (2, W*Cout)        row 0: conv-a BN bias, row 1: conv-b BN bias (pixel-tiled)
    o_ref  : (R, W*Cout)        lane-dense output slab
    """
    R = x_ref.shape[0]
    WC = o_ref.shape[1]                 # W * Cout (== W * Cmid for FAModule)

    # Row-coupling matrices for the dy = -1 / +1 halo, with the per-image row boundary
    # (SAME zero padding, and no bleed between batch-fused images) folded in.
    # Built once from iota compares and reused by both convs; exact 0/1 values.
    ri = lax.broadcasted_iota(jnp.int32, (R, R), 0)
    ci = lax.broadcasted_iota(jnp.int32, (R, R), 1)
    s_down = jnp.where((ri == ci + 1) & (ri % H != 0), 1.0, 0.0)        # out[y] += p_m[y-1]
    s_up = jnp.where((ri == ci - 1) & (ri % H != (H - 1)), 1.0, 0.0)    # out[y] += p_p[y+1]

    bias = b_ref[...]                   # (2, W*Cout) f32, loaded once

    def conv3x3_bn(inp_bf16, wc_ref, bias_row):
        # ONE MXU matmul per conv against the concatenated (dy=-1 | dy=0 | dy=+1) banded
        # weights; the dx taps and width-wise zero padding are folded into the bands.
        p = jnp.dot(inp_bf16, wc_ref[...], preferred_element_type=jnp.float32)  # (R, 3*WC)
        p_m = p[:, 0 * WC:1 * WC]       # dy = -1 band (needs rows shifted down by one)
        p_0 = p[:, 1 * WC:2 * WC]       # dy =  0 band
        p_p = p[:, 2 * WC:3 * WC]       # dy = +1 band (needs rows shifted up by one)
        acc = p_0
        acc = acc + jnp.dot(s_down, p_m, preferred_element_type=jnp.float32)
        acc = acc + jnp.dot(s_up, p_p, preferred_element_type=jnp.float32)
        return acc + bias_row

    x = x_ref[...].astype(jnp.bfloat16)                  # bf16 MXU inputs, f32 accumulation
    mid = conv3x3_bn(x, w1c_ref, bias[0:1, :])           # self.conva (conv3x3 + BN)
    # TODO(synk): FABlock (self.fa) is not defined in the provided spec; applied as identity.
    out = conv3x3_bn(mid.astype(jnp.bfloat16), w2c_ref, bias[1:2, :])   # self.convb
    o_ref[...] = out.astype(o_ref.dtype)                 # lane-dense (R, W*Cout) store


def _banded_weights_cat(w_hwio, scale, W):
    """Fold BN scale into the conv weights and build the three dy band matrices,
    concatenated along the output-column axis -> (W*Cin, 3*W*Cout) with
        band[ky][u*Cin + ci, w*Cout + co] = scale[co] * w_hwio[ky, u - w + 1, ci, co]
    for |u - w| <= 1, else 0  (encodes the dx taps and the width-wise zero padding)."""
    Cin, Cout = w_hwio.shape[2], w_hwio.shape[3]
    w_f = (w_hwio * scale[None, None, None, :]).astype(jnp.float32)
    bands = []
    for ky in range(3):
        band = jnp.zeros((W * Cin, W * Cout), jnp.float32)
        for kx in range(3):
            sel = jnp.eye(W, W, k=1 - kx, dtype=jnp.float32)  # sel[u, w] = 1 iff u == w + kx - 1
            band = band + jnp.kron(sel, w_f[ky, kx])
        bands.append(band)
    return jnp.concatenate(bands, axis=1)                 # (W*Cin, 3*W*Cout)


def prepare_params(w1, w2, s1, b1, s2, b2, W, weight_dtype=jnp.bfloat16):
    """One-time parameter preparation -- hoisted out of the per-call hot path.

    Returns (w1c, w2c, bias): concatenated banded bf16 weight matrices with the BN scale
    folded in, and the two pixel-tiled BN biases merged into a single (2, W*Cout) array.
    """
    w1c = _banded_weights_cat(w1, s1, W).astype(weight_dtype)   # (W*Cin,  3*W*Cmid)
    w2c = _banded_weights_cat(w2, s2, W).astype(weight_dtype)   # (W*Cmid, 3*W*Cout)
    bias = jnp.stack([jnp.tile(b1, W), jnp.tile(b2, W)], axis=0).astype(jnp.float32)
    return w1c, w2c, bias


def famodule_pallas(x_nhwc, w1c, w2c, bias, *, images_per_block=None):
    """x_nhwc: (N, H, W, Cin) f32; w1c/w2c/bias prebuilt by prepare_params().
    Returns (N, H, W, Cout) f32.  NHWC at the boundary (no NCHW transposes in the hot path)."""
    N, H, W, Cin = x_nhwc.shape
    WCin = W * Cin
    assert w1c.shape[1] == w2c.shape[1], "FAModule has Cmid == Cout"
    WCout = w2c.shape[1] // 3
    Cout = WCout // W

    if images_per_block is None:
        # Default keeps a >= 2-way "parallel" grid axis when N >= 2 (v7x: 2 TensorCores get
        # one image each).  On single-TC v5e/v6e pass images_per_block=N to fuse the whole
        # batch into one grid step (saves ~0.35 us/step overhead, doubles MXU row occupancy).
        images_per_block = 1 if N >= 2 else N
    assert N % images_per_block == 0
    G = images_per_block
    R = G * H

    # Contiguous reshape (no HBM pass): (N, H, W, Cin) -> (N*H, W*Cin) lane-packed rows.
    x2d = x_nhwc.reshape(N * H, WCin)

    out2d = pl.pallas_call(
        functools.partial(famodule_kernel, H=H),
        out_shape=jax.ShapeDtypeStruct((N * H, WCout), jnp.float32),
        grid=(N // G,),
        in_specs=[
            pl.BlockSpec((R, WCin), lambda n: (n, 0)),
            # Constant weights / merged bias: same block for every grid step.
            # TODO(synk): for larger W / channel counts, single-buffer these constant inputs
            # (pipeline_mode=pl.Buffered(1)) and switch to W-tiled bands -- the banded
            # matrices grow as O(W^2*Cin*Cout) (density 3/W) and would be the first VMEM
            # OOM on v7x's 64 MiB VMEM.
            pl.BlockSpec(w1c.shape, lambda n: (0, 0)),
            pl.BlockSpec(w2c.shape, lambda n: (0, 0)),
            pl.BlockSpec(bias.shape, lambda n: (0, 0)),
        ],
        out_specs=pl.BlockSpec((R, WCout), lambda n: (n, 0)),
        compiler_params=pltpu.CompilerParams(
            dimension_semantics=("parallel",),
            vmem_limit_bytes=32 * 1024 * 1024,   # explicit, safe on v5e/v6e/v7x
        ),
    )(x2d, w1c, w2c, bias)

    return out2d.reshape(N, H, W, Cout)


def ref_forward_nhwc(x_nhwc, w1, w2, s1, b1, s2, b2):
    """Plain-JAX f32 reference of the same computation (inference BN), NHWC layout."""
    dn = ('NHWC', 'HWIO', 'NHWC')
    y = lax.conv_general_dilated(x_nhwc, w1, (1, 1), 'SAME', dimension_numbers=dn,
                                 precision=lax.Precision.HIGHEST)
    y = y * s1 + b1                        # bn_a (inference, folded)
    # fa: FABlock undefined in the spec -> identity
    y = lax.conv_general_dilated(y, w2, (1, 1), 'SAME', dimension_numbers=dn,
                                 precision=lax.Precision.HIGHEST)
    y = y * s2 + b2                        # bn_b (inference, folded)
    return y


if __name__ == "__main__":
    # FAModule(in_channels=4, out_channels=8); input x: (N=2, C=4, H=16, W=16) NCHW (PyTorch).
    # (W * out_channels = 128 -> fully lane-dense slabs on TPU.)
    N, Cin, H, W = 2, 4, 16, 16
    Cout = 8
    eps = 1e-5

    key = jax.random.PRNGKey(0)
    ks = jax.random.split(key, 11)

    x_nchw = jax.random.normal(ks[0], (N, Cin, H, W), jnp.float32)

    # Conv weights (HWIO), no bias (conv3x3 has bias=False).
    w1 = jax.random.normal(ks[1], (3, 3, Cin, Cout), jnp.float32) * 0.1
    w2 = jax.random.normal(ks[2], (3, 3, Cout, Cout), jnp.float32) * 0.1

    # BatchNorm params folded into per-channel scale/bias (inference semantics).
    # TODO(synk): train-mode batch-statistic BN would need an extra cross-(N,H,W) reduction.
    gamma1 = 1.0 + 0.1 * jax.random.normal(ks[3], (Cout,), jnp.float32)
    beta1 = 0.1 * jax.random.normal(ks[4], (Cout,), jnp.float32)
    mean1 = 0.1 * jax.random.normal(ks[5], (Cout,), jnp.float32)
    var1 = jnp.abs(jax.random.normal(ks[6], (Cout,), jnp.float32)) + 0.5

    gamma2 = 1.0 + 0.1 * jax.random.normal(ks[7], (Cout,), jnp.float32)
    beta2 = 0.1 * jax.random.normal(ks[8], (Cout,), jnp.float32)
    mean2 = 0.1 * jax.random.normal(ks[9], (Cout,), jnp.float32)
    var2 = jnp.abs(jax.random.normal(ks[10], (Cout,), jnp.float32)) + 0.5

    s1 = gamma1 / jnp.sqrt(var1 + eps)
    b1 = beta1 - mean1 * s1
    s2 = gamma2 / jnp.sqrt(var2 + eps)
    b2 = beta2 - mean2 * s2

    # One-time parameter prep (hoisted out of the per-call path): banded bf16 weights + bias.
    w1c, w2c, bias = prepare_params(w1, w2, s1, b1, s2, b2, W)

    # NHWC at the kernel boundary; the single NCHW->NHWC conversion happens once, outside
    # the jitted hot path.  TODO(synk): adopt NHWC end-to-end to drop this conversion too.
    x_nhwc = jnp.transpose(x_nchw, (0, 2, 3, 1))

    fwd = jax.jit(famodule_pallas)
    out_nhwc = jax.block_until_ready(fwd(x_nhwc, w1c, w2c, bias))

    ref_nhwc = jax.block_until_ready(ref_forward_nhwc(x_nhwc, w1, w2, s1, b1, s2, b2))
    # bf16 weights/activations (f32 accumulation) vs f32 reference -> loosened tolerance.
    np.testing.assert_allclose(np.asarray(out_nhwc), np.asarray(ref_nhwc),
                               rtol=5e-2, atol=5e-2)

    print("KERNEL_OK")
</pallas_src>

<mosaic_0001>
module attributes {stable_mosaic.version = 11 : i64} {
  func.func @famodule_kernel(%arg0: i32, %arg1: memref<16x64xf32, #tpu.memory_space<vmem>>, %arg2: memref<64x384xbf16, #tpu.memory_space<vmem>>, %arg3: memref<128x384xbf16, #tpu.memory_space<vmem>>, %arg4: memref<2x128xf32, #tpu.memory_space<vmem>>, %arg5: memref<16x128xf32, #tpu.memory_space<vmem>>) attributes {dimension_semantics = [#tpu.dimension_semantics<parallel>], iteration_bounds = array<i64: 2>, scalar_prefetch = 0 : i64, scratch_operands = 0 : i64, tpu.core_type = #tpu.core_type<tc>, window_params = [{transform_indices = @transform_0, window_bounds = array<i64: 16, 64>}, {pipeline_mode = #tpu.pipeline_mode<synchronous>, transform_indices = @transform_1, window_bounds = array<i64: 64, 384>}, {pipeline_mode = #tpu.pipeline_mode<synchronous>, transform_indices = @transform_2, window_bounds = array<i64: 128, 384>}, {pipeline_mode = #tpu.pipeline_mode<synchronous>, transform_indices = @transform_3, window_bounds = array<i64: 2, 128>}, {transform_indices = @transform_4, window_bounds = array<i64: 16, 128>}]} {
    %0 = tpu.iota {dimensions = array<i32: 0>} : vector<16x16xi32>
    %1 = tpu.iota {dimensions = array<i32: 1>} : vector<16x16xi32>
    %c1_i32 = arith.constant 1 : i32
    %2 = vector.broadcast %c1_i32 : i32 to vector<16x16xi32>
    %3 = arith.addi %1, %2 : vector<16x16xi32>
    %4 = arith.cmpi eq, %0, %3 : vector<16x16xi32>
    %c16_i32 = arith.constant 16 : i32
    %c0_i32 = arith.constant 0 : i32
    %5 = arith.cmpi eq, %c16_i32, %c0_i32 : i32
    %c1_i32_0 = arith.constant 1 : i32
    %6 = arith.select %5, %c1_i32_0, %c16_i32 : i32
    %7 = vector.broadcast %6 : i32 to vector<16x16xi32>
    %8 = arith.remsi %0, %7 : vector<16x16xi32>
    %c0_i32_1 = arith.constant 0 : i32
    %9 = vector.broadcast %c0_i32_1 : i32 to vector<16x16xi32>
    %10 = arith.cmpi ne, %8, %9 : vector<16x16xi32>
    %c0_i32_2 = arith.constant 0 : i32
    %11 = vector.broadcast %c0_i32_2 : i32 to vector<16x16xi32>
    %12 = arith.cmpi slt, %8, %11 : vector<16x16xi32>
    %c0_i32_3 = arith.constant 0 : i32
    %13 = arith.cmpi slt, %6, %c0_i32_3 : i32
    %14 = vector.broadcast %13 : i1 to vector<16x16xi1>
    %15 = vector.broadcast %14 : vector<16x16xi1> to vector<16x16xi1>
    %16 = arith.xori %12, %15 : vector<16x16xi1>
    %17 = arith.andi %16, %10 : vector<16x16xi1>
    %18 = vector.broadcast %6 : i32 to vector<16x16xi32>
    %19 = arith.addi %8, %18 : vector<16x16xi32>
    %20 = arith.select %17, %19, %8 : vector<16x16xi1>, vector<16x16xi32>
    %c0_i32_4 = arith.constant 0 : i32
    %21 = vector.broadcast %c0_i32_4 : i32 to vector<16x16xi32>
    %22 = arith.cmpi ne, %20, %21 : vector<16x16xi32>
    %23 = arith.andi %4, %22 : vector<16x16xi1>
    %cst = arith.constant 1.000000e+00 : f32
    %cst_5 = arith.constant 0.000000e+00 : f32
    %24 = vector.broadcast %cst : f32 to vector<16x16xf32>
    %25 = vector.broadcast %cst_5 : f32 to vector<16x16xf32>
    %26 = arith.select %23, %24, %25 : vector<16x16xi1>, vector<16x16xf32>
    %c1_i32_6 = arith.constant 1 : i32
    %27 = vector.broadcast %c1_i32_6 : i32 to vector<16x16xi32>
    %28 = arith.subi %1, %27 : vector<16x16xi32>
    %29 = arith.cmpi eq, %0, %28 : vector<16x16xi32>
    %c16_i32_7 = arith.constant 16 : i32
    %c0_i32_8 = arith.constant 0 : i32
    %30 = arith.cmpi eq, %c16_i32_7, %c0_i32_8 : i32
    %c1_i32_9 = arith.constant 1 : i32
    %31 = arith.select %30, %c1_i32_9, %c16_i32_7 : i32
    %32 = vector.broadcast %31 : i32 to vector<16x16xi32>
    %33 = arith.remsi %0, %32 : vector<16x16xi32>
    %c0_i32_10 = arith.constant 0 : i32
    %34 = vector.broadcast %c0_i32_10 : i32 to vector<16x16xi32>
    %35 = arith.cmpi ne, %33, %34 : vector<16x16xi32>
    %c0_i32_11 = arith.constant 0 : i32
    %36 = vector.broadcast %c0_i32_11 : i32 to vector<16x16xi32>
    %37 = arith.cmpi slt, %33, %36 : vector<16x16xi32>
    %c0_i32_12 = arith.constant 0 : i32
    %38 = arith.cmpi slt, %31, %c0_i32_12 : i32
    %39 = vector.broadcast %38 : i1 to vector<16x16xi1>
    %40 = vector.broadcast %39 : vector<16x16xi1> to vector<16x16xi1>
    %41 = arith.xori %37, %40 : vector<16x16xi1>
    %42 = arith.andi %41, %35 : vector<16x16xi1>
    %43 = vector.broadcast %31 : i32 to vector<16x16xi32>
    %44 = arith.addi %33, %43 : vector<16x16xi32>
    %45 = arith.select %42, %44, %33 : vector<16x16xi1>, vector<16x16xi32>
    %c15_i32 = arith.constant 15 : i32
    %46 = vector.broadcast %c15_i32 : i32 to vector<16x16xi32>
    %47 = arith.cmpi ne, %45, %46 : vector<16x16xi32>
    %48 = arith.andi %29, %47 : vector<16x16xi1>
    %cst_13 = arith.constant 1.000000e+00 : f32
    %cst_14 = arith.constant 0.000000e+00 : f32
    %49 = vector.broadcast %cst_13 : f32 to vector<16x16xf32>
    %50 = vector.broadcast %cst_14 : f32 to vector<16x16xf32>
    %51 = arith.select %48, %49, %50 : vector<16x16xi1>, vector<16x16xf32>
    %c0 = arith.constant 0 : index
    %c0_15 = arith.constant 0 : index
    %52 = vector.load %arg4[%c0, %c0_15] : memref<2x128xf32, #tpu.memory_space<vmem>>, vector<2x128xf32>
    %c0_16 = arith.constant 0 : index
    %c0_17 = arith.constant 0 : index
    %53 = vector.load %arg1[%c0_16, %c0_17] : memref<16x64xf32, #tpu.memory_space<vmem>>, vector<16x64xf32>
    %54 = arith.truncf %53 : vector<16x64xf32> to vector<16x64xbf16>
    %55 = vector.extract_strided_slice %52 {offsets = [0, 0], sizes = [1, 128], strides = [1, 1]} : vector<2x128xf32> to vector<1x128xf32>
    %c0_18 = arith.constant 0 : index
    %c0_19 = arith.constant 0 : index
    %56 = vector.load %arg2[%c0_18, %c0_19] : memref<64x384xbf16, #tpu.memory_space<vmem>>, vector<64x384xbf16>
    %cst_20 = arith.constant dense<0.000000e+00> : vector<16x384xf32>
    %57 = tpu.matmul %54, %56, %cst_20 {dimension_numbers = #tpu.dot_dimension_numbers<[1], [0], [0], [1], [0, 0, 1, 1], [], []>} : vector<16x64xbf16>, vector<64x384xbf16>, vector<16x384xf32> -> vector<16x384xf32>
    %58 = vector.extract_strided_slice %57 {offsets = [0, 0], sizes = [16, 128], strides = [1, 1]} : vector<16x384xf32> to vector<16x128xf32>
    %59 = vector.extract_strided_slice %57 {offsets = [0, 128], sizes = [16, 128], strides = [1, 1]} : vector<16x384xf32> to vector<16x128xf32>
    %60 = vector.extract_strided_slice %57 {offsets = [0, 256], sizes = [16, 128], strides = [1, 1]} : vector<16x384xf32> to vector<16x128xf32>
    %cst_21 = arith.constant dense<0.000000e+00> : vector<16x128xf32>
    %61 = tpu.matmul %26, %58, %cst_21 {dimension_numbers = #tpu.dot_dimension_numbers<[1], [0], [0], [1], [0, 0, 1, 1], [], []>} : vector<16x16xf32>, vector<16x128xf32>, vector<16x128xf32> -> vector<16x128xf32>
    %62 = arith.addf %59, %61 : vector<16x128xf32>
    %cst_22 = arith.constant dense<0.000000e+00> : vector<16x128xf32>
    %63 = tpu.matmul %51, %60, %cst_22 {dimension_numbers = #tpu.dot_dimension_numbers<[1], [0], [0], [1], [0, 0, 1, 1], [], []>} : vector<16x16xf32>, vector<16x128xf32>, vector<16x128xf32> -> vector<16x128xf32>
    %64 = arith.addf %62, %63 : vector<16x128xf32>
    %65 = vector.broadcast %55 : vector<1x128xf32> to vector<16x128xf32>
    %66 = arith.addf %64, %65 : vector<16x128xf32>
    %67 = arith.truncf %66 : vector<16x128xf32> to vector<16x128xbf16>
    %68 = vector.extract_strided_slice %52 {offsets = [1, 0], sizes = [1, 128], strides = [1, 1]} : vector<2x128xf32> to vector<1x128xf32>
    %c0_23 = arith.constant 0 : index
    %c0_24 = arith.constant 0 : index
    %69 = vector.load %arg3[%c0_23, %c0_24] : memref<128x384xbf16, #tpu.memory_space<vmem>>, vector<128x384xbf16>
    %cst_25 = arith.constant dense<0.000000e+00> : vector<16x384xf32>
    %70 = tpu.matmul %67, %69, %cst_25 {dimension_numbers = #tpu.dot_dimension_numbers<[1], [0], [0], [1], [0, 0, 1, 1], [], []>} : vector<16x128xbf16>, vector<128x384xbf16>, vector<16x384xf32> -> vector<16x384xf32>
    %71 = vector.extract_strided_slice %70 {offsets = [0, 0], sizes = [16, 128], strides = [1, 1]} : vector<16x384xf32> to vector<16x128xf32>
    %72 = vector.extract_strided_slice %70 {offsets = [0, 128], sizes = [16, 128], strides = [1, 1]} : vector<16x384xf32> to vector<16x128xf32>
    %73 = vector.extract_strided_slice %70 {offsets = [0, 256], sizes = [16, 128], strides = [1, 1]} : vector<16x384xf32> to vector<16x128xf32>
    %cst_26 = arith.constant dense<0.000000e+00> : vector<16x128xf32>
    %74 = tpu.matmul %26, %71, %cst_26 {dimension_numbers = #tpu.dot_dimension_numbers<[1], [0], [0], [1], [0, 0, 1, 1], [], []>} : vector<16x16xf32>, vector<16x128xf32>, vector<16x128xf32> -> vector<16x128xf32>
    %75 = arith.addf %72, %74 : vector<16x128xf32>
    %cst_27 = arith.constant dense<0.000000e+00> : vector<16x128xf32>
    %76 = tpu.matmul %51, %73, %cst_27 {dimension_numbers = #tpu.dot_dimension_numbers<[1], [0], [0], [1], [0, 0, 1, 1], [], []>} : vector<16x16xf32>, vector<16x128xf32>, vector<16x128xf32> -> vector<16x128xf32>
    %77 = arith.addf %75, %76 : vector<16x128xf32>
    %78 = vector.broadcast %68 : vector<1x128xf32> to vector<16x128xf32>
    %79 = arith.addf %77, %78 : vector<16x128xf32>
    %c0_28 = arith.constant 0 : index
    %c0_29 = arith.constant 0 : index
    %80 = vector.load %arg5[%c0_28, %c0_29] : memref<16x128xf32, #tpu.memory_space<vmem>>, vector<16x128xf32>
    tpu.vector_store %arg5[%c0_28, %c0_29], %79 {strides = array<i32>} : memref<16x128xf32, #tpu.memory_space<vmem>>, vector<16x128xf32>,
    return
  }
  func.func @transform_0(%arg0: i32) -> (i32, i32) {
    %c0_i32 = arith.constant 0 : i32
    %c0_i32_0 = arith.constant 0 : i32
    return %arg0, %c0_i32 : i32, i32
  }
  func.func @transform_1(%arg0: i32) -> (i32, i32) {
    %c0_i32 = arith.constant 0 : i32
    %c0_i32_0 = arith.constant 0 : i32
    %c0_i32_1 = arith.constant 0 : i32
    return %c0_i32, %c0_i32_0 : i32, i32
  }
  func.func @transform_2(%arg0: i32) -> (i32, i32) {
    %c0_i32 = arith.constant 0 : i32
    %c0_i32_0 = arith.constant 0 : i32
    %c0_i32_1 = arith.constant 0 : i32
    return %c0_i32, %c0_i32_0 : i32, i32
  }
  func.func @transform_3(%arg0: i32) -> (i32, i32) {
    %c0_i32 = arith.constant 0 : i32
    %c0_i32_0 = arith.constant 0 : i32
    %c0_i32_1 = arith.constant 0 : i32
    return %c0_i32, %c0_i32_0 : i32, i32
  }
  func.func @transform_4(%arg0: i32) -> (i32, i32) {
    %c0_i32 = arith.constant 0 : i32
    %c0_i32_0 = arith.constant 0 : i32
    return %arg0, %c0_i32 : i32, i32
  }
}

</mosaic_0001>

<bundles_post_ra>
// kernel: famodule_pallas.1
= control target key start
LH: loop header
LB: loop body
LE: loop exit
PB: predicated region body
PF: predicated region fallthrough
CT: control target
= control target key end

     0   :  { %s1316_s15 = smov 0   ;;  %s1511_s0 = inlined_call_operand.vmem [shape: f32[32,64], index: 0, kind: input, shape index: {}]   ;;  %s1512_s1 = inlined_call_operand.vmem [shape: bf16[64,384], index: 1, kind: input, shape index: {}]   ;;  %s1513_s2 = inlined_call_operand.vmem [shape: bf16[128,384], index: 2, kind: input, shape index: {}]   ;;  %s1514_s3 = inlined_call_operand.vmem [shape: f32[2,128], index: 3, kind: input, shape index: {}]   ;;  %s1515_s4 = inlined_call_operand.vmem [shape: f32[32,128], index: 4, kind: output, shape index: {}]  }
   0x1 LB: > { %s1057_s16 = sadd.s32 4294967295, %s1286_s15   ;;  %p1061_p0 = scmp.ge.s32.totalorder %s1286_s15, 1  ;;  %s1286_s15 = sphi %s1316_s15, %s14_s15  }
   0x2   : > { %p163_p1 = scmp.lt.s32.totalorder %s1286_s15, 3 }
   0x4   : > { %p164_p2 = pnand %p1061_p0, %p163_p1 }
   0x5   : > { %v1232_v0 = vld [vmem:[%s1512_s1 + $0x4] ss:$12 sps:$4 sm:$0xff] (!%p164_p2)   ;;  %v1288_v1 = vmov (!%p164_p2), 0.0   ;;  %v1234_v2 = vld [vmem:[%s1512_s1 + $0x8] ss:$12 sps:$4 sm:$0xff] (!%p164_p2)   ;;  %vm1289_vm0 = vmmov (!%p164_p2), 0   ;;  %v202_v17 = vlaneseq (!%p164_p2) }
   0x6   : > { %167 = sbr.rel (%p164_p2) target bundleno = 904 (0x388), region = 36  ;;  %1145 = vmatprep.subr.bf16.mxu1 (!%p164_p2), %v1288_v1  ;;  %1153 = vmatprep.mubr.msk.bf16.mxu1 (!%p164_p2), %vm1289_vm0, %v1288_v1  ;;  %v1235_v3 = vld [vmem:[%s1512_s1] ss:$12 sps:$4 sm:$0xff] (!%p164_p2)   ;;  %s1062_s23 = sshll.u32 (!%p164_p2), %s1057_s16, 1  ;;  %v1236_v4 = vld [vmem:[%s1512_s1 + $0x1c] ss:$12 sps:$4 sm:$0xff] (!%p164_p2)  }
   0x7   : > { %337 = vmatprep.subr.bf16.mxu0 (!%p164_p2), %v1232_v0  ;;  %1146 = vmatpush3.bf16.msra.mxu1 (!%p164_p2), %v1234_v2  ;;  %v1290_v5 = vmov (!%p164_p2), 0   ;;  %v1238_v6 = vld [vmem:[%s1512_s1 + $0x20] ss:$12 sps:$4 sm:$0xff] (!%p164_p2)   ;;  %v1239_v7 = vld [vmem:[%s1512_s1 + $0x18] ss:$12 sps:$4 sm:$0xff] (!%p164_p2)   ;;  %p190_p3 = scmp.lt.s32.totalorder (!%p164_p2), %s1062_s23, 3 }
   0x8   : > { %369 = vmatprep.mubr.bf16.mxu0 (!%p164_p2), %v1290_v5  ;;  %338 = vmatpush1.bf16.msra.mxu0 (!%p164_p2), %v1235_v3  ;;  %v1240_v8 = vld [vmem:[%s1512_s1 + $0x34] ss:$12 sps:$4 sm:$0xff] (!%p164_p2)   ;;  %v1242_v9 = vld [vmem:[%s1512_s1 + $0x38] ss:$12 sps:$4 sm:$0xff] (!%p164_p2)   ;;  %v1243_v10 = vld [vmem:[%s1512_s1 + $0x30] ss:$12 sps:$4 sm:$0xff] (!%p164_p2)  }
   0x9   : > { %1147 = vmatprep.subr.bf16.mxu1 (!%p164_p2), %v1288_v1  ;;  %339 = vmatprep.subr.bf16.mxu0 (!%p164_p2), %v1236_v4  ;;  %v1244_v11 = vld [vmem:[%s1512_s1 + $0x4c] ss:$12 sps:$4 sm:$0xff] (!%p164_p2)   ;;  %v1246_v12 = vld [vmem:[%s1512_s1 + $0x50] ss:$12 sps:$4 sm:$0xff] (!%p164_p2)   ;;  %v1247_v13 = vld [vmem:[%s1512_s1 + $0x48] ss:$12 sps:$4 sm:$0xff] (!%p164_p2)  }
   0xa   : > { %vm333_vm1 = vcmask (!%p164_p2), 523264   ;;  %v1375_v18 = vshrl.u32 (!%p164_p2), %v202_v17, 7  ;;  %v206_v19 = vand.u32 (!%p164_p2), 127, %v202_v17  ;;  %vm421_vm5 = vcmask (!%p164_p2), 130048   ;;  %v1250_v37 = vld [vmem:[%s1513_s2 + $0x4] ss:$12 sps:$4 sm:$0xff] (!%p164_p2)  }
   0xb   : > { %1148 = vmatpush3.bf16.msra.mxu1 (!%p164_p2), %v1238_v6  ;;  %v1251_v39 = vld [vmem:[%s1513_s2 + $0x8] ss:$12 sps:$4 sm:$0xff] (!%p164_p2)   ;;  %v1248_v41 = vld [vmem:[%s1513_s2] ss:$12 sps:$4 sm:$0xff] (!%p164_p2)   ;;  %v1252_v44 = vld [vmem:[%s1513_s2 + $0x18] ss:$12 sps:$4 sm:$0xff] (!%p164_p2)  }
   0xc   : > { %340 = vmatpush1.bf16.msra.mxu0 (!%p164_p2), %v1239_v7  ;;  %1149 = vmatprep.subr.bf16.mxu1 (!%p164_p2), %v1288_v1  ;;  %v207_v20 = vadd.s32 (!%p164_p2), 1, %v206_v19  ;;  %v214_v21 = vand.u32 (!%p164_p2), 15, %v1375_v18  ;;  %v1066_v22 = vadd.s32 (!%p164_p2), 4294967295, %v206_v19  ;;  %v204_v25 = vadd.s32 (!%p164_p2), 8, %v1375_v18  ;;  %v1254_v42 = vld [vmem:[%s1513_s2 + $0x1c] ss:$12 sps:$4 sm:$0xff] (!%p164_p2)  }
   0xd   : > { %s1517_s23 = smov (!%p190_p3, %s1062_s23), 3  ;;  %341 = vmatprep.subr.bf16.mxu0 %v1240_v8  ;;  %v1255_v43 = vld [vmem:[%s1513_s2 + $0x20] ss:$12 sps:$4 sm:$0xff]   ;;  %v1259_v46 = vld [vmem:[%s1513_s2 + $0x38] ss:$12 sps:$4 sm:$0xff]   ;;  %v590_v63 = vsub.s32 0, %v1375_v18 }
   0xe   : > { %s1063_s14 = sshll.u32 %s1517_s23, 3  ;;  %vm208_vm2 = vcmp.eq.s32.totalorder %v1375_v18, %v207_v20  ;;  %vm234_vm3 = vcmp.ne.s32.totalorder %v214_v21, 0  ;;  %vm241_vm6 = vcmp.eq.s32.totalorder %v1375_v18, %v1066_v22  ;;  %v221_v26 = vand.u32 15, %v204_v25  ;;  %v1258_v45 = vld [vmem:[%s1513_s2 + $0x34] ss:$12 sps:$4 sm:$0xff]  }
   0xf   : > { %s193_s20 = scalar_lea.vmem %s1511_s0, %s1063_s14  ;;  %1150 = vmatpush3.bf16.msra.mxu1 %v1242_v9  ;;  %vm236_vm4 = vmand %vm208_vm2, %vm234_vm3  ;;  %v1386_v24 = vsel %vm241_vm6, 1.0, %v1288_v1  ;;  %vm242_vm7 = vcmp.eq.s32.totalorder %v204_v25, %v1066_v22  ;;  %vm209_vm10 = vcmp.eq.s32.totalorder %v204_v25, %v207_v20  ;;  %v1256_v47 = vld [vmem:[%s1513_s2 + $0x30] ss:$12 sps:$4 sm:$0xff]   ;;  %v1262_v48 = vld [vmem:[%s1513_s2 + $0x4c] ss:$12 sps:$4 sm:$0xff]   ;;  %s199_s28 = scalar_lea.vmem %s1515_s4, %s1063_s14 }
  0x10   : > { %v250_v14 = vld [vmem:[%s193_s20] sm:$0xff]  ;;  %v251_v15 = vld [vmem:[%s193_s20 + $0x8] sm:$0xff]  ;;  %342 = vmatpush1.bf16.msra.mxu0 %v1243_v10  ;;  %1151 = vmatprep.subr.bf16.mxu1 %v1288_v1  ;;  %v1380_v23 = vsel %vm236_vm4, 1.0, %v1288_v1  ;;  %vm244_vm8 = vcmp.ne.s32.totalorder %v221_v26, 15  ;;  %v1405_v40 = vsel %vm209_vm10, 1.0, %v1288_v1 }
  0x11   : > { %343 = vmatprep.subr.bf16.mxu0 %v1244_v11  ;;  %v252_v16 = vpack.c.bf16 %v251_v15, %v250_v14  ;;  %vm246_vm9 = vmand %vm242_vm7, %vm244_vm8  ;;  %v1263_v49 = vld [vmem:[%s1513_s2 + $0x50] ss:$12 sps:$4 sm:$0xff]   ;;  %v1260_v50 = vld [vmem:[%s1513_s2 + $0x48] ss:$12 sps:$4 sm:$0xff]  }
  0x12   : > { %v1399_v38 = vsel %vm246_vm9, 1.0, %v1288_v1  ;;  %v1266_v51 = vld [vmem:[%s1513_s2 + $0x64] ss:$12 sps:$4 sm:$0xff]   ;;  %v1267_v52 = vld [vmem:[%s1513_s2 + $0x68] ss:$12 sps:$4 sm:$0xff]  }
  0x13   : > { %1152 = vmatpush3.bf16.msra.mxu1 %v1246_v12  ;;  %v1264_v53 = vld [vmem:[%s1513_s2 + $0x60] ss:$12 sps:$4 sm:$0xff]   ;;  %v1270_v54 = vld [vmem:[%s1513_s2 + $0x7c] ss:$12 sps:$4 sm:$0xff]   ;;  %v1268_v56 = vld [vmem:[%s1513_s2 + $0x78] ss:$12 sps:$4 sm:$0xff]  }
  0x14   : > { %344 = vmatpush1.bf16.msra.mxu0 %v1247_v13  ;;  %v1271_v55 = vld [vmem:[%s1513_s2 + $0x80] ss:$12 sps:$4 sm:$0xff]   ;;  %v1272_v58 = vld [vmem:[%s1513_s2 + $0x90] ss:$12 sps:$4 sm:$0xff]   ;;  %v1275_v59 = vld [vmem:[%s1513_s2 + $0x98] ss:$12 sps:$4 sm:$0xff]  }
  0x15   : > { %v1274_v57 = vld [vmem:[%s1513_s2 + $0x94] ss:$12 sps:$4 sm:$0xff]   ;;  %v1278_v60 = vld [vmem:[%s1513_s2 + $0xac] ss:$12 sps:$4 sm:$0xff]   ;;  %v1279_v62 = vld [vmem:[%s1513_s2 + $0xb0] ss:$12 sps:$4 sm:$0xff]  }
  0x16   : > { %1154 = vmatmul.mubr.msk.bf16.vlgmr.msra.gmra.mrb[0].mxu1 %vm333_vm1, %v252_v16  ;;  %v1276_v61 = vld [vmem:[%s1513_s2 + $0xa8] ss:$12 sps:$4 sm:$0xff]   ;;  %v249_v0 = vld [vmem:[%s1514_s3] sm:$0x3] }
  0x17   : > { %1079 = vmatmul.mubr.msk.bf16.vlgmr.msra.gmra.mrb[0].mxu0 %vm333_vm1, %v252_v16  ;;  %1168 = vmatprep.mubr.msk.f32.mxu1 %vm421_vm5, %v1386_v24  ;;  %v591_v6 = vrot.slane %v249_v0, %v590_v63 }
  0x18   : > { %1161 = vmatprep.mubr.msk.f32.mxu0 %vm421_vm5, %v1380_v23 }
  0xe9   : > { %v414_v27 = vpop.f32.mrb[0].mxu1 }
  0xea   : > { %v371_v28 = vpop.f32.mrb[0].mxu0  ;;  %v1155_v29 = vpop.f32.mrb[1].mxu1 }
  0xeb   : > { %v1391_v30 = vpop.f32.mrb[1].mxu0  ;;  %v417_v31 = vpop.f32.mrb[2].mxu1 }
  0xec   : > { %v1209_v32 = vpack.c.bf16 %v417_v31, %v414_v27  ;;  %v375_v33 = vpop.f32.mrb[2].mxu0  ;;  %v1156_v34 = vpop.f32.mrb[3].mxu1 }
  0xed   : > { %v1205_v35 = vpack.c.bf16 %v375_v33, %v371_v28  ;;  %v1393_v36 = vpop.f32.mrb[3].mxu0 }
  0xee   : > { %1210 = vmatprep.subr.bf16.mxu1 %v1209_v32 }
  0xef   : > { %1206 = vmatprep.subr.bf16.mxu0 %v1205_v35  ;;  %1212 = vmatpush3.bf16.msra.mxu1 %v1209_v32 }
  0xf0   : > { %1208 = vmatpush3.bf16.msra.mxu0 %v1205_v35  ;;  %1171 = vmatprep.subr.bf16.mxu1 %v1288_v1 }
  0xf1   : > { %755 = vmatprep.subr.bf16.mxu0 %v1250_v37 }
  0xf2   : > { %1169 = vmatmul.mubr.msk.f32.vlgmr.msra.gmra.mrb[4].mxu1 %vm421_vm5, %v1399_v38 }
  0xf3   : > { %1162 = vmatmul.mubr.msk.f32.vlgmr.msra.gmra.mrb[4].mxu0 %vm421_vm5, %v1405_v40  ;;  %1172 = vmatpush3.bf16.msra.mxu1 %v1251_v39 }
  0xf4   : > { %756 = vmatpush1.bf16.msra.mxu0 %v1248_v41  ;;  %1173 = vmatprep.subr.bf16.mxu1 %v1288_v1 }
  0xf5   : > { %757 = vmatprep.subr.bf16.mxu0 %v1254_v42  ;;  %787 = vmatprep.mubr.bf16.mxu0 %v1290_v5 }
  0xf6   : > { %1187 = vmatprep.mubr.msk.bf16.mxu1 %vm1289_vm0, %v1288_v1 }
  0xf7   : > { %1174 = vmatpush3.bf16.msra.mxu1 %v1255_v43 }
  0xf8   : > { %758 = vmatpush1.bf16.msra.mxu0 %v1252_v44  ;;  %1175 = vmatprep.subr.bf16.mxu1 %v1288_v1 }
  0xf9   : > { %759 = vmatprep.subr.bf16.mxu0 %v1258_v45 }
  0xfb   : > { %1176 = vmatpush3.bf16.msra.mxu1 %v1259_v46 }
  0xfc   : > { %760 = vmatpush1.bf16.msra.mxu0 %v1256_v47  ;;  %1177 = vmatprep.subr.bf16.mxu1 %v1288_v1 }
  0xfd   : > { %761 = vmatprep.subr.bf16.mxu0 %v1262_v48 }
  0xff   : > { %1178 = vmatpush3.bf16.msra.mxu1 %v1263_v49 }
 0x100   : > { %762 = vmatpush1.bf16.msra.mxu0 %v1260_v50  ;;  %1179 = vmatprep.subr.bf16.mxu1 %v1288_v1 }
 0x101   : > { %763 = vmatprep.subr.bf16.mxu0 %v1266_v51 }
 0x103   : > { %1180 = vmatpush3.bf16.msra.mxu1 %v1267_v52 }
 0x104   : > { %764 = vmatpush1.bf16.msra.mxu0 %v1264_v53  ;;  %1181 = vmatprep.subr.bf16.mxu1 %v1288_v1 }
 0x105   : > { %765 = vmatprep.subr.bf16.mxu0 %v1270_v54 }
 0x107   : > { %1182 = vmatpush3.bf16.msra.mxu1 %v1271_v55 }
 0x108   : > { %766 = vmatpush1.bf16.msra.mxu0 %v1268_v56  ;;  %1183 = vmatprep.subr.bf16.mxu1 %v1288_v1 }
 0x109   : > { %767 = vmatprep.subr.bf16.mxu0 %v1274_v57 }
 0x10b   : > { %1184 = vmatpush3.bf16.msra.mxu1 %v1275_v59 }
 0x10c   : > { %768 = vmatpush1.bf16.msra.mxu0 %v1272_v58  ;;  %1185 = vmatprep.subr.bf16.mxu1 %v1288_v1 }
 0x10d   : > { %769 = vmatprep.subr.bf16.mxu0 %v1278_v60 }
 0x10f   : > { %1186 = vmatpush3.bf16.msra.mxu1 %v1279_v62 }
 0x110   : > { %770 = vmatpush1.bf16.msra.mxu0 %v1276_v61 }
 0x1c5   : > { %v1170_v2 = vpop.f32.mrb[4].mxu1 }
 0x1c6   : > { %v1163_v3 = vpop.f32.mrb[4].mxu0  ;;  %v577_v1 = vpop.f32.mrb[5].mxu1 }
 0x1c7   : > { %v504_v4 = vadd.f32 %v1163_v3, %v1393_v36  ;;  %v494_v5 = vpop.f32.mrb[5].mxu0 }
 0x1c8   : > { %v503_v7 = vadd.f32 %v494_v5, %v1391_v30 }
 0x1c9   : > { %v587_v8 = vadd.f32 %v1170_v2, %v504_v4 }
 0x1ca   : > { %v586_v9 = vadd.f32 %v577_v1, %v503_v7 }
 0x1cb   : > { %v593_v10 = vadd.f32 %v591_v6, %v587_v8 }
 0x1cc   : > { %v592_v11 = vadd.f32 %v591_v6, %v586_v9 }
 0x1ce   : > { %v594_v12 = vpack.c.bf16 %v593_v10, %v592_v11 }
 0x1d0   : > { %788 = vmatmul.mubr.bf16.vlgmr.msra.gmra.mrb[8].mxu0 %v594_v12  ;;  %1188 = vmatmul.mubr.bf16.vlgmr.msra.gmra.mrb[8].mxu1 %v594_v12 }
 0x1d1   : > { %1195 = vmatprep.mubr.msk.f32.mxu0 %vm421_vm5, %v1380_v23  ;;  %1202 = vmatprep.mubr.msk.f32.mxu1 %vm421_vm5, %v1386_v24  ;;  %v995_v23 = vsub.s32 1, %v1375_v18 }
 0x1d3   : > { %v996_v31 = vrot.slane %v249_v0, %v995_v23 }
 0x2a3   : > { %v789_v13 = vpop.f32.mrb[8].mxu0  ;;  %v832_v14 = vpop.f32.mrb[8].mxu1 }
 0x2a4   : > { %v791_v15 = vpop.f32.mrb[9].mxu0  ;;  %v1189_v16 = vpop.f32.mrb[9].mxu1 }
 0x2a5   : > { %v793_v17 = vpop.f32.mrb[10].mxu0  ;;  %v835_v19 = vpop.f32.mrb[10].mxu1 }
 0x2a6   : > { %v1213_v20 = vpack.c.bf16 %v793_v17, %v789_v13  ;;  %v1217_v21 = vpack.c.bf16 %v835_v19, %v832_v14  ;;  %v795_v22 = vpop.f32.mrb[11].mxu0  ;;  %v1190_v25 = vpop.f32.mrb[11].mxu1 }
 0x2a8   : > { %1214 = vmatprep.subr.bf16.mxu0 %v1213_v20  ;;  %1218 = vmatprep.subr.bf16.mxu1 %v1217_v21 }
 0x2a9   : > { %1216 = vmatpush3.bf16.msra.mxu0 %v1213_v20  ;;  %1220 = vmatpush3.bf16.msra.mxu1 %v1217_v21 }
 0x2ac   : > { %1196 = vmatmul.mubr.msk.f32.vlgmr.msra.gmra.mrb[6].mxu0 %vm421_vm5, %v1405_v40  ;;  %1203 = vmatmul.mubr.msk.f32.vlgmr.msra.gmra.mrb[6].mxu1 %vm421_vm5, %v1399_v38 }
 0x37f   : > { %v1197_v24 = vpop.f32.mrb[6].mxu0  ;;  %v1204_v26 = vpop.f32.mrb[6].mxu1 }
 0x380   : > { %v915_v27 = vadd.f32 %v1197_v24, %v795_v22  ;;  %v905_v28 = vpop.f32.mrb[7].mxu0  ;;  %v982_v29 = vpop.f32.mrb[7].mxu1 }
 0x381   : > { %v914_v30 = vadd.f32 %v905_v28, %v791_v15 }
 0x382   : > { %v992_v32 = vadd.f32 %v1204_v26, %v915_v27 }
 0x383   : > { %v991_v33 = vadd.f32 %v982_v29, %v914_v30 }
 0x384   : > { %v998_v35 = vadd.f32 %v996_v31, %v992_v32 }
 0x385   : > { %v997_v34 = vadd.f32 %v996_v31, %v991_v33 }
 0x386   : > { %1000 = vst [vmem:[%s199_s28 + $0x8] sm:$0xff] %v998_v35 }
 0x387   : > { %999 = vst [vmem:[%s199_s28] sm:$0xff] %v997_v34 }
 0x388 PF: > { %s14_s15 = sadd.s32 1, %s1286_s15  }
 0x389   : > { %p11_p4 = scmp.ge.s32.totalorder %s14_s15, 4  }
 0x38b   :  { %13 = sbr.rel (!%p11_p4) target bundleno = 1 (0x1), region = 66 }

</bundles_post_ra>
